<compile_context>
chip_gen: v7x
topology: tpu7x:2x2x1
jax: 0.10.0
libtpu: 0.0.40
codegen_flags: <defaults>
</compile_context>

<pallas_src>
import functools

import jax
import jax.numpy as jnp
from jax.experimental import pallas as pl
from jax.experimental.pallas import tpu as pltpu


# ---------------------------------------------------------------------------
# helpers
# ---------------------------------------------------------------------------

def _round_up(x, m):
    return (x + m - 1) // m * m


def _pick_tile(dim, max_tile):
    """Largest tile <= max_tile; if dim is small, use the whole (8-rounded) dim."""
    d8 = _round_up(dim, 8)
    return max_tile if d8 >= max_tile else d8


@functools.lru_cache(maxsize=1)
def _vmem_cap_bytes():
    try:
        return int(pltpu.get_tpu_info().vmem_capacity_bytes)
    except Exception:
        return 64 * 1024 * 1024          # conservative (v7x physical VMEM)


@functools.lru_cache(maxsize=1)
def _matmul_tile_max():
    """256 tiles for the 2x256^2 MXU (v6e/v7x); 128 for v5e's 4x128^2 MXU."""
    try:
        kind = jax.devices()[0].device_kind.lower()
    except Exception:
        kind = ""
    if "v5 lite" in kind or "v5e" in kind or "v5litepod" in kind:
        return 128
    return 256


def _compiler_params(semantics, est_block_bytes):
    cap = max(32 * 1024 * 1024, int(_vmem_cap_bytes() * 0.75))
    limit = int(min(max(3 * est_block_bytes, 32 * 1024 * 1024), cap))
    return pltpu.CompilerParams(dimension_semantics=semantics,
                                vmem_limit_bytes=limit)


def _pad2(a, rows, cols):
    pr, pc = rows - a.shape[0], cols - a.shape[1]
    if pr == 0 and pc == 0:
        return a
    return jnp.pad(a, ((0, pr), (0, pc)))


def _pad_axis(x, axis, target):
    pad = target - x.shape[axis]
    if pad == 0:
        return x
    cfg = [(0, 0)] * x.ndim
    cfg[axis] = (0, pad)
    return jnp.pad(x, cfg)


# ---------------------------------------------------------------------------
# Fused multi-projection kernel (Q/K/V in one launch)
# ---------------------------------------------------------------------------

def _fused_proj_kernel(*refs, n_proj):
    x_refs = refs[:n_proj]
    w_refs = refs[n_proj:2 * n_proj]
    b_refs = refs[2 * n_proj:3 * n_proj]
    o_ref = refs[3 * n_proj]
    acc_ref = refs[3 * n_proj + 1]            # (n_proj, tm, Np) f32 scratch

    kk = pl.program_id(1)

    @pl.when(kk == 0)
    def _init():
        acc_ref[...] = jnp.zeros_like(acc_ref)

    for j in range(n_proj):                   # unrolled at trace time (3 dots / step)
        acc_ref[j] += jnp.dot(x_refs[j][...], w_refs[j][...],
                              preferred_element_type=jnp.float32)

    @pl.when(kk == pl.num_programs(1) - 1)
    def _finalize():
        # Build the full (tm, n_proj*Np) row block and store it with ONE
        # unmasked, lane-dense write (review: no per-projection column slices).
        parts = [acc_ref[j] + b_refs[j][...] for j in range(n_proj)]
        o_ref[...] = jnp.concatenate(parts, axis=-1).astype(o_ref.dtype)


def fused_projection(xs, ws, bs, out_dtype):
    """[x_j @ w_j + b_j] for all j in one pallas_call.

    xs: list of (M, K); ws: list of (K, Np); bs: list of (1, Np) f32.
    Returns (M, n_proj * Np) with columns ordered [proj_0 | proj_1 | ...].
    """
    n_proj = len(xs)
    M, K = xs[0].shape
    Np = ws[0].shape[1]
    out_width = n_proj * Np

    itm = jnp.dtype(xs[0].dtype).itemsize
    out_itm = jnp.dtype(out_dtype).itemsize

    # Tile M so the double-buffered output block stays ~<=16 MiB, K so the
    # double-buffered weight blocks stay ~<=24 MiB (matters for big H*D on v7x).
    max_tm = _matmul_tile_max()
    while max_tm > 8 and 2 * max_tm * out_width * out_itm > (16 << 20):
        max_tm //= 2
    max_tk = 512
    while max_tk > 128 and 2 * n_proj * max_tk * Np * itm > (24 << 20):
        max_tk //= 2

    tm = _pick_tile(M, max_tm)
    tk = _pick_tile(K, max_tk)
    m_pad = _round_up(M, tm)
    k_pad = _round_up(K, tk)
    gm, gk = m_pad // tm, k_pad // tk

    xs = [_pad2(x, m_pad, k_pad) for x in xs]
    ws = [_pad2(w, k_pad, Np) for w in ws]

    x_specs = [pl.BlockSpec((tm, tk), lambda m, kk: (m, kk)) for _ in range(n_proj)]
    w_specs = [pl.BlockSpec((tk, Np), lambda m, kk: (kk, 0)) for _ in range(n_proj)]
    b_specs = [pl.BlockSpec((1, Np), lambda m, kk: (0, 0)) for _ in range(n_proj)]

    est = (2 * n_proj * (tm * tk + tk * Np) * itm
           + 2 * n_proj * Np * 4
           + 2 * tm * out_width * out_itm
           + n_proj * tm * Np * 4)

    out = pl.pallas_call(
        functools.partial(_fused_proj_kernel, n_proj=n_proj),
        out_shape=jax.ShapeDtypeStruct((m_pad, out_width), out_dtype),
        grid=(gm, gk),
        in_specs=x_specs + w_specs + b_specs,
        out_specs=pl.BlockSpec((tm, out_width), lambda m, kk: (m, 0)),
        scratch_shapes=[pltpu.VMEM((n_proj, tm, Np), jnp.float32)],
        compiler_params=_compiler_params(("parallel", "arbitrary"), est),
    )(*xs, *ws, *bs)
    return out[:M] if m_pad != M else out


# ---------------------------------------------------------------------------
# Generic tiled linear (output projection)
# ---------------------------------------------------------------------------

def _matmul_bias_kernel(x_ref, w_ref, b_ref, o_ref, acc_ref):
    kk = pl.program_id(2)

    @pl.when(kk == 0)
    def _init():
        acc_ref[...] = jnp.zeros_like(acc_ref)

    acc_ref[...] += jnp.dot(x_ref[...], w_ref[...],
                            preferred_element_type=jnp.float32)

    @pl.when(kk == pl.num_programs(2) - 1)
    def _finalize():
        o_ref[...] = (acc_ref[...] + b_ref[...]).astype(o_ref.dtype)


def linear_tiled(x, w, b, out_dtype):
    """y = x @ w + b with an (M, N, K)-tiled grid and f32 VMEM accumulator."""
    M, K = x.shape
    N = w.shape[1]

    mx = _matmul_tile_max()
    tm = _pick_tile(M, mx)
    tn = _pick_tile(N, mx)
    tk = _pick_tile(K, 512)
    m_pad, n_pad, k_pad = _round_up(M, tm), _round_up(N, tn), _round_up(K, tk)
    gm, gn, gk = m_pad // tm, n_pad // tn, k_pad // tk

    xp = _pad2(x, m_pad, k_pad)
    wp = _pad2(w, k_pad, n_pad)
    bp = _pad2(b, 1, n_pad)

    itm = jnp.dtype(x.dtype).itemsize
    est = 2 * (tm * tk + tk * tn) * itm + 2 * (tm * tn + tn) * 4 + tm * tn * 4

    out = pl.pallas_call(
        _matmul_bias_kernel,
        out_shape=jax.ShapeDtypeStruct((m_pad, n_pad), out_dtype),
        grid=(gm, gn, gk),
        in_specs=[
            pl.BlockSpec((tm, tk), lambda m, n, kk: (m, kk)),
            pl.BlockSpec((tk, tn), lambda m, n, kk: (kk, n)),
            pl.BlockSpec((1, tn), lambda m, n, kk: (0, n)),
        ],
        out_specs=pl.BlockSpec((tm, tn), lambda m, n, kk: (m, n)),
        scratch_shapes=[pltpu.VMEM((tm, tn), jnp.float32)],
        compiler_params=_compiler_params(("parallel", "parallel", "arbitrary"), est),
    )(xp, wp, bp)
    if m_pad != M or n_pad != N:
        out = out[:M, :N]
    return out


# ---------------------------------------------------------------------------
# Attention — flash path (return_scores=False): grid = (B, H, q-tile, kv-tile)
# ---------------------------------------------------------------------------

def _flash_attention_kernel(*refs, has_bias):
    q_ref, k_ref, v_ref = refs[0], refs[1], refs[2]      # (tq,D), (tk,D), (tk,D)
    idx = 3
    bias_ref = None
    if has_bias:
        bias_ref = refs[idx]                              # (tq, tk) f32 additive bias
        idx += 1
    o_ref = refs[idx]                                     # (tq, D)
    m_sc, l_sc, acc_sc = refs[idx + 1], refs[idx + 2], refs[idx + 3]

    ki = pl.program_id(3)

    @pl.when(ki == 0)
    def _init():
        m_sc[...] = jnp.full_like(m_sc, -jnp.inf)
        l_sc[...] = jnp.zeros_like(l_sc)
        acc_sc[...] = jnp.zeros_like(acc_sc)

    # scores = q @ k^T (1/sqrt(d_k) already folded into the Q projection)
    s = jax.lax.dot_general(q_ref[...], k_ref[...], (((1,), (1,)), ((), ())),
                            preferred_element_type=jnp.float32)       # (tq, tk)
    if has_bias:
        s = s + bias_ref[...]                 # masked_fill(mask==0, -1e9) as additive bias

    m_prev = m_sc[...]
    m_new = jnp.maximum(m_prev, jnp.max(s, axis=-1, keepdims=True))
    alpha = jnp.exp(m_prev - m_new)
    p = jnp.exp(s - m_new)
    l_sc[...] = alpha * l_sc[...] + jnp.sum(p, axis=-1, keepdims=True)
    acc_sc[...] = alpha * acc_sc[...] + jnp.dot(
        p.astype(v_ref.dtype), v_ref[...], preferred_element_type=jnp.float32)
    m_sc[...] = m_new

    @pl.when(ki == pl.num_programs(3) - 1)
    def _finalize():
        # Exact division (review: avoid approx reciprocal in the softmax denom).
        o_ref[...] = (acc_sc[...] / l_sc[...]).astype(o_ref.dtype)


def _flash_attention(q, k, v, bias, *, out_dtype):
    """q: (B,H,Lq,D); k,v: (B,H,Lkv,D); bias: (Lq,Lkv) f32 additive or None."""
    B, H, Lq, D = q.shape
    Lkv = k.shape[2]
    tq = _pick_tile(Lq, 256)
    tk = _pick_tile(Lkv, 512)
    Lq_p = _round_up(Lq, tq)
    Lkv_p = _round_up(Lkv, tk)
    has_bias = (bias is not None) or (Lkv_p != Lkv)

    q = _pad_axis(q, 2, Lq_p)
    k = _pad_axis(k, 2, Lkv_p)
    v = _pad_axis(v, 2, Lkv_p)
    if has_bias:
        if bias is None:
            bias = jnp.zeros((Lq, Lkv), jnp.float32)
        # Padded KV columns get -1e9 so they never contribute.
        bias = jnp.pad(bias, ((0, Lq_p - Lq), (0, Lkv_p - Lkv)),
                       constant_values=jnp.float32(-1.0e9))

    nq, nk = Lq_p // tq, Lkv_p // tk

    in_specs = [
        pl.BlockSpec((pl.Squeezed(), pl.Squeezed(), tq, D),
                     lambda b, h, qi, ki: (b, h, qi, 0)),
        pl.BlockSpec((pl.Squeezed(), pl.Squeezed(), tk, D),
                     lambda b, h, qi, ki: (b, h, ki, 0)),
        pl.BlockSpec((pl.Squeezed(), pl.Squeezed(), tk, D),
                     lambda b, h, qi, ki: (b, h, ki, 0)),
    ]
    args = [q, k, v]
    if has_bias:
        in_specs.append(pl.BlockSpec((tq, tk), lambda b, h, qi, ki: (qi, ki)))
        args.append(bias)

    itm = jnp.dtype(q.dtype).itemsize
    est = (2 * (tq * D + 2 * tk * D) * itm
           + 2 * tq * D * jnp.dtype(out_dtype).itemsize
           + (2 * tq * tk * 4 if has_bias else 0)
           + tq * (D + 2) * 4)

    out = pl.pallas_call(
        functools.partial(_flash_attention_kernel, has_bias=has_bias),
        out_shape=jax.ShapeDtypeStruct((B, H, Lq_p, D), out_dtype),
        grid=(B, H, nq, nk),
        in_specs=in_specs,
        out_specs=pl.BlockSpec((pl.Squeezed(), pl.Squeezed(), tq, D),
                               lambda b, h, qi, ki: (b, h, qi, 0)),
        scratch_shapes=[pltpu.VMEM((tq, 1), jnp.float32),
                        pltpu.VMEM((tq, 1), jnp.float32),
                        pltpu.VMEM((tq, D), jnp.float32)],
        compiler_params=_compiler_params(
            ("parallel", "parallel", "parallel", "arbitrary"), est),
    )(*args)
    return out[:, :, :Lq, :] if Lq_p != Lq else out


# ---------------------------------------------------------------------------
# Attention — scores path (return_scores=True): grid = (B, H, q-tile)
# ---------------------------------------------------------------------------

def _attention_scores_kernel(*refs, has_bias):
    q_ref, k_ref, v_ref = refs[0], refs[1], refs[2]      # (tq,D), (Lkv,D), (Lkv,D)
    idx = 3
    bias_ref = None
    if has_bias:
        bias_ref = refs[idx]                              # (tq, Lkv) f32
        idx += 1
    o_ref, s_ref = refs[idx], refs[idx + 1]               # (tq, D), (tq, Lkv)

    s = jax.lax.dot_general(q_ref[...], k_ref[...], (((1,), (1,)), ((), ())),
                            preferred_element_type=jnp.float32)       # (tq, Lkv)
    if has_bias:
        s = s + bias_ref[...]
    s = s - jnp.max(s, axis=-1, keepdims=True)
    e = jnp.exp(s)
    p = e / jnp.sum(e, axis=-1, keepdims=True)

    o_ref[...] = jnp.dot(p.astype(v_ref.dtype), v_ref[...],
                         preferred_element_type=jnp.float32).astype(o_ref.dtype)
    s_ref[...] = p.astype(s_ref.dtype)                    # one lane-dense (tq, Lkv) store


def _attention_with_scores(q, k, v, bias, *, out_dtype, scores_dtype):
    B, H, Lq, D = q.shape
    Lkv = k.shape[2]
    Lkv_p = _round_up(Lkv, 8)

    tq = _pick_tile(Lq, 256)
    # Keep one head's (tq, Lkv) f32 scores tile bounded (~4 MiB) for v7x's 64 MiB VMEM.
    while tq > 8 and tq * Lkv_p * 4 > (4 << 20):
        tq = max(8, (tq // 2) // 8 * 8)
    Lq_p = _round_up(Lq, tq)

    has_bias = (bias is not None) or (Lkv_p != Lkv)
    q = _pad_axis(q, 2, Lq_p)
    k = _pad_axis(k, 2, Lkv_p)
    v = _pad_axis(v, 2, Lkv_p)
    if has_bias:
        if bias is None:
            bias = jnp.zeros((Lq, Lkv), jnp.float32)
        bias = jnp.pad(bias, ((0, Lq_p - Lq), (0, Lkv_p - Lkv)),
                       constant_values=jnp.float32(-1.0e9))
    nq = Lq_p // tq

    in_specs = [
        pl.BlockSpec((pl.Squeezed(), pl.Squeezed(), tq, D),
                     lambda b, h, qi: (b, h, qi, 0)),
        pl.BlockSpec((pl.Squeezed(), pl.Squeezed(), Lkv_p, D),
                     lambda b, h, qi: (b, h, 0, 0)),
        pl.BlockSpec((pl.Squeezed(), pl.Squeezed(), Lkv_p, D),
                     lambda b, h, qi: (b, h, 0, 0)),
    ]
    args = [q, k, v]
    if has_bias:
        in_specs.append(pl.BlockSpec((tq, Lkv_p), lambda b, h, qi: (qi, 0)))
        args.append(bias)

    itm = jnp.dtype(q.dtype).itemsize
    est = (2 * (tq * D + 2 * Lkv_p * D) * itm
           + 2 * tq * D * jnp.dtype(out_dtype).itemsize
           + 2 * tq * Lkv_p * jnp.dtype(scores_dtype).itemsize
           + (2 * tq * Lkv_p * 4 if has_bias else 0)
           + 3 * tq * Lkv_p * 4)

    out, scores = pl.pallas_call(
        functools.partial(_attention_scores_kernel, has_bias=has_bias),
        out_shape=(jax.ShapeDtypeStruct((B, H, Lq_p, D), out_dtype),
                   jax.ShapeDtypeStruct((B, H, Lq_p, Lkv_p), scores_dtype)),
        grid=(B, H, nq),
        in_specs=in_specs,
        out_specs=(pl.BlockSpec((pl.Squeezed(), pl.Squeezed(), tq, D),
                                lambda b, h, qi: (b, h, qi, 0)),
                   pl.BlockSpec((pl.Squeezed(), pl.Squeezed(), tq, Lkv_p),
                                lambda b, h, qi: (b, h, qi, 0))),
        compiler_params=_compiler_params(("parallel", "parallel", "parallel"), est),
    )(*args)

    if Lq_p != Lq or Lkv_p != Lkv:
        out = out[:, :, :Lq, :]
        scores = scores[:, :, :Lq, :Lkv]
    return out, scores


def scaled_dot_product_attention(q, k, v, bias, *, return_scores, out_dtype,
                                 scores_dtype=jnp.float32):
    if return_scores:
        return _attention_with_scores(q, k, v, bias, out_dtype=out_dtype,
                                      scores_dtype=scores_dtype)
    return _flash_attention(q, k, v, bias, out_dtype=out_dtype), None


# ---------------------------------------------------------------------------
# Module: parameter init + forward
# ---------------------------------------------------------------------------

def init_mha_params(key, n_head, in_dim, out_dim):
    """PyTorch-style (uniform +/- 1/sqrt(fan_in)) initialization."""
    keys = jax.random.split(key, 8)

    def lin_init(kw, kb, fan_in, fan_out):
        bound = 1.0 / (fan_in ** 0.5)
        w = jax.random.uniform(kw, (fan_in, fan_out), jnp.float32, -bound, bound)
        b = jax.random.uniform(kb, (1, fan_out), jnp.float32, -bound, bound)
        return w, b

    wq, bq = lin_init(keys[0], keys[1], in_dim, n_head * out_dim)
    wk, bk = lin_init(keys[2], keys[3], in_dim, n_head * out_dim)
    wv, bv = lin_init(keys[4], keys[5], in_dim, n_head * out_dim)
    wo, bo = lin_init(keys[6], keys[7], n_head * out_dim, out_dim)
    return dict(n_head=n_head, out_dim=out_dim,
                wq=wq, bq=bq, wk=wk, bk=bk, wv=wv, bv=bv, wo=wo, bo=bo)


def multi_head_attention(params, q, k, v, mask=None, *, return_scores=True,
                         use_bf16_matmul=False, scores_dtype=jnp.float32):
    n_head = params["n_head"]
    Dh = params["out_dim"]
    B, Lq, in_dim = q.shape
    Lkv = k.shape[1]
    HD = n_head * Dh

    # Fold the reference's q / sqrt(d_k) scaling into the Q projection.
    scale = 1.0 / (float(Dh) ** 0.5)
    wq, bq = params["wq"] * scale, params["bq"] * scale
    wk, bk = params["wk"], params["bk"]
    wv, bv = params["wv"], params["bv"]
    wo, bo = params["wo"], params["bo"]

    # bf16 MXU operands (recommended on v5e/v6e/v7x); accumulation/softmax stay f32.
    cdt = jnp.bfloat16 if use_bf16_matmul else q.dtype
    cast = lambda a: a.astype(cdt)

    q2d = cast(q.reshape(B * Lq, in_dim))
    k2d = cast(k.reshape(B * Lkv, in_dim))
    v2d = cast(v.reshape(B * Lkv, in_dim))

    if Lq == Lkv:
        # One fused pallas_call for all three projections.
        qkv = fused_projection([q2d, k2d, v2d],
                               [cast(wq), cast(wk), cast(wv)],
                               [bq, bk, bv], out_dtype=cdt)
        qkv = qkv.reshape(B, Lq, 3, n_head, Dh)
        # Head-major layout so attention sees contiguous lane-dense (L, D) blocks.
        qkv = jnp.transpose(qkv, (2, 0, 3, 1, 4))          # (3, B, H, L, D)
        qh, kh, vh = qkv[0], qkv[1], qkv[2]
    else:
        # Cross-attention with different lengths: fuse only K and V.
        qp = fused_projection([q2d], [cast(wq)], [bq], out_dtype=cdt)
        kvp = fused_projection([k2d, v2d], [cast(wk), cast(wv)], [bk, bv],
                               out_dtype=cdt)
        qh = jnp.transpose(qp.reshape(B, Lq, n_head, Dh), (0, 2, 1, 3))
        kv = jnp.transpose(kvp.reshape(B, Lkv, 2, n_head, Dh), (2, 0, 3, 1, 4))
        kh, vh = kv[0], kv[1]

    bias = None
    if mask is not None:
        assert mask.ndim == 2, "mask must be (Lq, Lkv), broadcast over batch & heads"
        # Single additive bias plane; reproduces masked_fill(mask==0, -1e9).
        bias = jnp.where(mask == 0, jnp.float32(-1.0e9), jnp.float32(0.0))

    out_bhld, scores = scaled_dot_product_attention(
        qh, kh, vh, bias, return_scores=return_scores,
        out_dtype=cdt, scores_dtype=scores_dtype)

    # (B, H, Lq, D) -> (B*Lq, H*D) for the output projection (PyTorch's transpose+view).
    ctx = jnp.transpose(out_bhld, (0, 2, 1, 3)).reshape(B * Lq, HD)
    y = linear_tiled(cast(ctx), cast(wo), bo, out_dtype=q.dtype)
    return y.reshape(B, Lq, Dh), scores


# ---------------------------------------------------------------------------
# Pure-JAX reference (for sanity checking only)
# ---------------------------------------------------------------------------

def _reference_mha(params, q, k, v, mask=None):
    H, D = params["n_head"], params["out_dim"]
    B, Lq, _ = q.shape
    Lkv = k.shape[1]
    qh = (q @ params["wq"] + params["bq"]).reshape(B, Lq, H, D).transpose(0, 2, 1, 3)
    kh = (k @ params["wk"] + params["bk"]).reshape(B, Lkv, H, D).transpose(0, 2, 1, 3)
    vh = (v @ params["wv"] + params["bv"]).reshape(B, Lkv, H, D).transpose(0, 2, 1, 3)
    s = jnp.einsum("bhqd,bhkd->bhqk", qh / (float(D) ** 0.5), kh)
    if mask is not None:
        s = jnp.where(mask[None, None] == 0, jnp.float32(-1.0e9), s)
    p = jax.nn.softmax(s, axis=-1)
    o = jnp.einsum("bhqk,bhkd->bhqd", p, vh)
    o = o.transpose(0, 2, 1, 3).reshape(B, Lq, H * D)
    return o @ params["wo"] + params["bo"], p


# ---------------------------------------------------------------------------
# Demo / smoke test
# ---------------------------------------------------------------------------

if __name__ == "__main__":
    B, L, IN_DIM = 2, 8, 32
    N_HEAD, OUT_DIM = 4, 16

    key = jax.random.PRNGKey(0)
    key_q, key_k, key_v, key_p = jax.random.split(key, 4)

    q = jax.random.normal(key_q, (B, L, IN_DIM), jnp.float32)
    k = jax.random.normal(key_k, (B, L, IN_DIM), jnp.float32)
    v = jax.random.normal(key_v, (B, L, IN_DIM), jnp.float32)

    params = init_mha_params(key_p, N_HEAD, IN_DIM, OUT_DIM)

    # (1) Unmasked, scores returned (matches the PyTorch forward exactly).
    out, scores = multi_head_attention(params, q, k, v, mask=None)
    jax.block_until_ready((out, scores))
    assert out.shape == (B, L, OUT_DIM)
    assert scores.shape == (B, N_HEAD, L, L)

    # (2) Masked (causal) variant, scores path.
    causal = jnp.tril(jnp.ones((L, L), jnp.int32))
    out_m, scores_m = multi_head_attention(params, q, k, v, mask=causal)
    jax.block_until_ready((out_m, scores_m))
    assert out_m.shape == (B, L, OUT_DIM)
    assert scores_m.shape == (B, N_HEAD, L, L)

    # (3) Flash path (no O(L^2) scores writeback), f32 — must match the scores path.
    out_flash, none_scores = multi_head_attention(params, q, k, v, mask=causal,
                                                  return_scores=False)
    jax.block_until_ready(out_flash)
    assert none_scores is None
    assert jnp.allclose(out_flash, out_m, atol=1e-3, rtol=1e-3)

    # (4) Flash path with bf16 MXU operands (recommended production config).
    out_bf16, _ = multi_head_attention(params, q, k, v, mask=causal,
                                       return_scores=False, use_bf16_matmul=True)
    jax.block_until_ready(out_bf16)
    assert out_bf16.shape == (B, L, OUT_DIM)

    # Sanity vs. a pure-JAX reference (loose tolerance: MXU vs XLA matmul rounding).
    with jax.default_matmul_precision("float32"):
        ref_out, ref_scores = _reference_mha(params, q, k, v, mask=causal)
    assert jnp.allclose(out_m, ref_out, atol=2e-2, rtol=2e-2)
    assert jnp.allclose(scores_m, ref_scores, atol=2e-2, rtol=2e-2)

    print("KERNEL_OK")
</pallas_src>

<mosaic_0001>
module attributes {stable_mosaic.version = 11 : i64} {
  func.func @_fused_proj_kernel(%arg0: i32, %arg1: i32, %arg2: memref<16x32xf32, #tpu.memory_space<vmem>>, %arg3: memref<16x32xf32, #tpu.memory_space<vmem>>, %arg4: memref<16x32xf32, #tpu.memory_space<vmem>>, %arg5: memref<32x64xf32, #tpu.memory_space<vmem>>, %arg6: memref<32x64xf32, #tpu.memory_space<vmem>>, %arg7: memref<32x64xf32, #tpu.memory_space<vmem>>, %arg8: memref<1x64xf32, #tpu.memory_space<vmem>>, %arg9: memref<1x64xf32, #tpu.memory_space<vmem>>, %arg10: memref<1x64xf32, #tpu.memory_space<vmem>>, %arg11: memref<16x192xf32, #tpu.memory_space<vmem>>, %arg12: memref<3x16x64xf32, #tpu.memory_space<vmem>>) attributes {dimension_semantics = [#tpu.dimension_semantics<parallel>, #tpu.dimension_semantics<arbitrary>], iteration_bounds = array<i64: 1, 1>, scalar_prefetch = 0 : i64, scratch_operands = 1 : i64, tpu.core_type = #tpu.core_type<tc>, window_params = [{transform_indices = @transform_0, window_bounds = array<i64: 16, 32>}, {transform_indices = @transform_1, window_bounds = array<i64: 16, 32>}, {transform_indices = @transform_2, window_bounds = array<i64: 16, 32>}, {transform_indices = @transform_3, window_bounds = array<i64: 32, 64>}, {transform_indices = @transform_4, window_bounds = array<i64: 32, 64>}, {transform_indices = @transform_5, window_bounds = array<i64: 32, 64>}, {pipeline_mode = #tpu.pipeline_mode<synchronous>, transform_indices = @transform_6, window_bounds = array<i64: 1, 64>}, {pipeline_mode = #tpu.pipeline_mode<synchronous>, transform_indices = @transform_7, window_bounds = array<i64: 1, 64>}, {pipeline_mode = #tpu.pipeline_mode<synchronous>, transform_indices = @transform_8, window_bounds = array<i64: 1, 64>}, {transform_indices = @transform_9, window_bounds = array<i64: 16, 192>}]} {
    %c0_i32 = arith.constant 0 : i32
    %0 = arith.cmpi eq, %arg1, %c0_i32 : i32
    %1 = arith.extui %0 : i1 to i32
    %c0_i32_0 = arith.constant 0 : i32
    %2 = arith.cmpi ne, %1, %c0_i32_0 : i32
    scf.if %2 {
      %cst_32 = arith.constant 0.000000e+00 : f32
      %33 = vector.broadcast %cst_32 : f32 to vector<3x16x64xf32>
      %c0_33 = arith.constant 0 : index
      %c0_34 = arith.constant 0 : index
      %c0_35 = arith.constant 0 : index
      %34 = vector.load %arg12[%c0_33, %c0_34, %c0_35] : memref<3x16x64xf32, #tpu.memory_space<vmem>>, vector<3x16x64xf32>
      tpu.vector_store %arg12[%c0_33, %c0_34, %c0_35], %33 {strides = array<i32>} : memref<3x16x64xf32, #tpu.memory_space<vmem>>, vector<3x16x64xf32>,
    } else {
    }
    %c0 = arith.constant 0 : index
    %c0_1 = arith.constant 0 : index
    %c0_2 = arith.constant 0 : index
    %3 = vector.load %arg12[%c0, %c0_1, %c0_2] : memref<3x16x64xf32, #tpu.memory_space<vmem>>, vector<1x16x64xf32>
    %4 = vector.shape_cast %3 : vector<1x16x64xf32> to vector<16x64xf32>
    %c0_3 = arith.constant 0 : index
    %c0_4 = arith.constant 0 : index
    %5 = vector.load %arg2[%c0_3, %c0_4] : memref<16x32xf32, #tpu.memory_space<vmem>>, vector<16x32xf32>
    %c0_5 = arith.constant 0 : index
    %c0_6 = arith.constant 0 : index
    %6 = vector.load %arg5[%c0_5, %c0_6] : memref<32x64xf32, #tpu.memory_space<vmem>>, vector<32x64xf32>
    %cst = arith.constant dense<0.000000e+00> : vector<16x64xf32>
    %7 = tpu.matmul %5, %6, %cst {dimension_numbers = #tpu.dot_dimension_numbers<[1], [0], [0], [1], [0, 0, 1, 1], [], []>} : vector<16x32xf32>, vector<32x64xf32>, vector<16x64xf32> -> vector<16x64xf32>
    %8 = arith.addf %4, %7 : vector<16x64xf32>
    %c0_7 = arith.constant 0 : index
    %c0_8 = arith.constant 0 : index
    %c0_9 = arith.constant 0 : index
    %9 = vector.load %arg12[%c0_7, %c0_8, %c0_9] : memref<3x16x64xf32, #tpu.memory_space<vmem>>, vector<1x16x64xf32>
    %10 = vector.shape_cast %9 : vector<1x16x64xf32> to vector<16x64xf32>
    %11 = vector.shape_cast %8 : vector<16x64xf32> to vector<1x16x64xf32>
    tpu.vector_store %arg12[%c0_7, %c0_8, %c0_9], %11 {strides = array<i32>} : memref<3x16x64xf32, #tpu.memory_space<vmem>>, vector<1x16x64xf32>,
    %c1 = arith.constant 1 : index
    %c0_10 = arith.constant 0 : index
    %c0_11 = arith.constant 0 : index
    %12 = vector.load %arg12[%c1, %c0_10, %c0_11] : memref<3x16x64xf32, #tpu.memory_space<vmem>>, vector<1x16x64xf32>
    %13 = vector.shape_cast %12 : vector<1x16x64xf32> to vector<16x64xf32>
    %c0_12 = arith.constant 0 : index
    %c0_13 = arith.constant 0 : index
    %14 = vector.load %arg3[%c0_12, %c0_13] : memref<16x32xf32, #tpu.memory_space<vmem>>, vector<16x32xf32>
    %c0_14 = arith.constant 0 : index
    %c0_15 = arith.constant 0 : index
    %15 = vector.load %arg6[%c0_14, %c0_15] : memref<32x64xf32, #tpu.memory_space<vmem>>, vector<32x64xf32>
    %cst_16 = arith.constant dense<0.000000e+00> : vector<16x64xf32>
    %16 = tpu.matmul %14, %15, %cst_16 {dimension_numbers = #tpu.dot_dimension_numbers<[1], [0], [0], [1], [0, 0, 1, 1], [], []>} : vector<16x32xf32>, vector<32x64xf32>, vector<16x64xf32> -> vector<16x64xf32>
    %17 = arith.addf %13, %16 : vector<16x64xf32>
    %c1_17 = arith.constant 1 : index
    %c0_18 = arith.constant 0 : index
    %c0_19 = arith.constant 0 : index
    %18 = vector.load %arg12[%c1_17, %c0_18, %c0_19] : memref<3x16x64xf32, #tpu.memory_space<vmem>>, vector<1x16x64xf32>
    %19 = vector.shape_cast %18 : vector<1x16x64xf32> to vector<16x64xf32>
    %20 = vector.shape_cast %17 : vector<16x64xf32> to vector<1x16x64xf32>
    tpu.vector_store %arg12[%c1_17, %c0_18, %c0_19], %20 {strides = array<i32>} : memref<3x16x64xf32, #tpu.memory_space<vmem>>, vector<1x16x64xf32>,
    %c2 = arith.constant 2 : index
    %c0_20 = arith.constant 0 : index
    %c0_21 = arith.constant 0 : index
    %21 = vector.load %arg12[%c2, %c0_20, %c0_21] : memref<3x16x64xf32, #tpu.memory_space<vmem>>, vector<1x16x64xf32>
    %22 = vector.shape_cast %21 : vector<1x16x64xf32> to vector<16x64xf32>
    %c0_22 = arith.constant 0 : index
    %c0_23 = arith.constant 0 : index
    %23 = vector.load %arg4[%c0_22, %c0_23] : memref<16x32xf32, #tpu.memory_space<vmem>>, vector<16x32xf32>
    %c0_24 = arith.constant 0 : index
    %c0_25 = arith.constant 0 : index
    %24 = vector.load %arg7[%c0_24, %c0_25] : memref<32x64xf32, #tpu.memory_space<vmem>>, vector<32x64xf32>
    %cst_26 = arith.constant dense<0.000000e+00> : vector<16x64xf32>
    %25 = tpu.matmul %23, %24, %cst_26 {dimension_numbers = #tpu.dot_dimension_numbers<[1], [0], [0], [1], [0, 0, 1, 1], [], []>} : vector<16x32xf32>, vector<32x64xf32>, vector<16x64xf32> -> vector<16x64xf32>
    %26 = arith.addf %22, %25 : vector<16x64xf32>
    %c2_27 = arith.constant 2 : index
    %c0_28 = arith.constant 0 : index
    %c0_29 = arith.constant 0 : index
    %27 = vector.load %arg12[%c2_27, %c0_28, %c0_29] : memref<3x16x64xf32, #tpu.memory_space<vmem>>, vector<1x16x64xf32>
    %28 = vector.shape_cast %27 : vector<1x16x64xf32> to vector<16x64xf32>
    %29 = vector.shape_cast %26 : vector<16x64xf32> to vector<1x16x64xf32>
    tpu.vector_store %arg12[%c2_27, %c0_28, %c0_29], %29 {strides = array<i32>} : memref<3x16x64xf32, #tpu.memory_space<vmem>>, vector<1x16x64xf32>,
    %c0_i32_30 = arith.constant 0 : i32
    %30 = arith.cmpi eq, %arg1, %c0_i32_30 : i32
    %31 = arith.extui %30 : i1 to i32
    %c0_i32_31 = arith.constant 0 : i32
    %32 = arith.cmpi ne, %31, %c0_i32_31 : i32
    scf.if %32 {
      %c0_32 = arith.constant 0 : index
      %c0_33 = arith.constant 0 : index
      %c0_34 = arith.constant 0 : index
      %33 = vector.load %arg12[%c0_32, %c0_33, %c0_34] : memref<3x16x64xf32, #tpu.memory_space<vmem>>, vector<1x16x64xf32>
      %34 = vector.shape_cast %33 : vector<1x16x64xf32> to vector<16x64xf32>
      %c0_35 = arith.constant 0 : index
      %c0_36 = arith.constant 0 : index
      %35 = vector.load %arg8[%c0_35, %c0_36] : memref<1x64xf32, #tpu.memory_space<vmem>>, vector<1x64xf32>
      %36 = vector.broadcast %35 : vector<1x64xf32> to vector<16x64xf32>
      %37 = arith.addf %34, %36 : vector<16x64xf32>
      %c1_37 = arith.constant 1 : index
      %c0_38 = arith.constant 0 : index
      %c0_39 = arith.constant 0 : index
      %38 = vector.load %arg12[%c1_37, %c0_38, %c0_39] : memref<3x16x64xf32, #tpu.memory_space<vmem>>, vector<1x16x64xf32>
      %39 = vector.shape_cast %38 : vector<1x16x64xf32> to vector<16x64xf32>
      %c0_40 = arith.constant 0 : index
      %c0_41 = arith.constant 0 : index
      %40 = vector.load %arg9[%c0_40, %c0_41] : memref<1x64xf32, #tpu.memory_space<vmem>>, vector<1x64xf32>
      %41 = vector.broadcast %40 : vector<1x64xf32> to vector<16x64xf32>
      %42 = arith.addf %39, %41 : vector<16x64xf32>
      %c2_42 = arith.constant 2 : index
      %c0_43 = arith.constant 0 : index
      %c0_44 = arith.constant 0 : index
      %43 = vector.load %arg12[%c2_42, %c0_43, %c0_44] : memref<3x16x64xf32, #tpu.memory_space<vmem>>, vector<1x16x64xf32>
      %44 = vector.shape_cast %43 : vector<1x16x64xf32> to vector<16x64xf32>
      %c0_45 = arith.constant 0 : index
      %c0_46 = arith.constant 0 : index
      %45 = vector.load %arg10[%c0_45, %c0_46] : memref<1x64xf32, #tpu.memory_space<vmem>>, vector<1x64xf32>
      %46 = vector.broadcast %45 : vector<1x64xf32> to vector<16x64xf32>
      %47 = arith.addf %44, %46 : vector<16x64xf32>
      %48 = tpu.concatenate %37, %42, %47 in 1 : vector<16x64xf32>, vector<16x64xf32>, vector<16x64xf32> -> vector<16x192xf32>
      %c0_47 = arith.constant 0 : index
      %c0_48 = arith.constant 0 : index
      %49 = vector.load %arg11[%c0_47, %c0_48] : memref<16x192xf32, #tpu.memory_space<vmem>>, vector<16x192xf32>
      tpu.vector_store %arg11[%c0_47, %c0_48], %48 {strides = array<i32>} : memref<16x192xf32, #tpu.memory_space<vmem>>, vector<16x192xf32>,
    } else {
    }
    return
  }
  func.func @transform_0(%arg0: i32, %arg1: i32) -> (i32, i32) {
    %c0_i32 = arith.constant 0 : i32
    return %arg0, %arg1 : i32, i32
  }
  func.func @transform_1(%arg0: i32, %arg1: i32) -> (i32, i32) {
    %c0_i32 = arith.constant 0 : i32
    return %arg0, %arg1 : i32, i32
  }
  func.func @transform_2(%arg0: i32, %arg1: i32) -> (i32, i32) {
    %c0_i32 = arith.constant 0 : i32
    return %arg0, %arg1 : i32, i32
  }
  func.func @transform_3(%arg0: i32, %arg1: i32) -> (i32, i32) {
    %c0_i32 = arith.constant 0 : i32
    %c0_i32_0 = arith.constant 0 : i32
    return %arg1, %c0_i32 : i32, i32
  }
  func.func @transform_4(%arg0: i32, %arg1: i32) -> (i32, i32) {
    %c0_i32 = arith.constant 0 : i32
    %c0_i32_0 = arith.constant 0 : i32
    return %arg1, %c0_i32 : i32, i32
  }
  func.func @transform_5(%arg0: i32, %arg1: i32) -> (i32, i32) {
    %c0_i32 = arith.constant 0 : i32
    %c0_i32_0 = arith.constant 0 : i32
    return %arg1, %c0_i32 : i32, i32
  }
  func.func @transform_6(%arg0: i32, %arg1: i32) -> (i32, i32) {
    %c0_i32 = arith.constant 0 : i32
    %c0_i32_0 = arith.constant 0 : i32
    %c0_i32_1 = arith.constant 0 : i32
    return %c0_i32, %c0_i32_0 : i32, i32
  }
  func.func @transform_7(%arg0: i32, %arg1: i32) -> (i32, i32) {
    %c0_i32 = arith.constant 0 : i32
    %c0_i32_0 = arith.constant 0 : i32
    %c0_i32_1 = arith.constant 0 : i32
    return %c0_i32, %c0_i32_0 : i32, i32
  }
  func.func @transform_8(%arg0: i32, %arg1: i32) -> (i32, i32) {
    %c0_i32 = arith.constant 0 : i32
    %c0_i32_0 = arith.constant 0 : i32
    %c0_i32_1 = arith.constant 0 : i32
    return %c0_i32, %c0_i32_0 : i32, i32
  }
  func.func @transform_9(%arg0: i32, %arg1: i32) -> (i32, i32) {
    %c0_i32 = arith.constant 0 : i32
    %c0_i32_0 = arith.constant 0 : i32
    return %arg0, %c0_i32 : i32, i32
  }
}

</mosaic_0001>

<bundles_post_ra>
// kernel: tpu_custom_call.1
= control target key start
LH: loop header
LB: loop body
LE: loop exit
PB: predicated region body
PF: predicated region fallthrough
CT: control target
= control target key end

     0   :  { %14 = vsyncpa [#allocation4], 0  ;;  %s957_s0 = inlined_call_operand.hbm [shape: f32[16,32], index: 0, kind: input, shape index: {}]   ;;  %s958_s1 = inlined_call_operand.hbm [shape: f32[16,32], index: 1, kind: input, shape index: {}]   ;;  %s959_s2 = inlined_call_operand.hbm [shape: f32[16,32], index: 2, kind: input, shape index: {}]   ;;  %s960_s3 = inlined_call_operand.hbm [shape: f32[32,64], index: 3, kind: input, shape index: {}]   ;;  %s961_s4 = inlined_call_operand.hbm [shape: f32[32,64], index: 4, kind: input, shape index: {}]   ;;  %s962_s5 = inlined_call_operand.hbm [shape: f32[32,64], index: 5, kind: input, shape index: {}]   ;;  %s963_s6 = inlined_call_operand.vmem [shape: f32[1,64], index: 6, kind: input, shape index: {}]   ;;  %s964_s7 = inlined_call_operand.vmem [shape: f32[1,64], index: 7, kind: input, shape index: {}]   ;;  %s965_s8 = inlined_call_operand.vmem [shape: f32[1,64], index: 8, kind: input, shape index: {}]   ;;  %s966_s9 = inlined_call_operand.hbm [shape: f32[16,192], index: 9, kind: output, shape index: {}]  }
   0x1   :  { %15 = vsyncpa [#allocation7], 0 }
   0x2   :  { %16 = vsyncpa [#allocation10], 0 }
   0x3   :  { %17 = vsyncpa [#allocation13], 0 }
   0x4   :  { %18 = vsyncpa [#allocation5], 0  ;;  %s740_s30 = smov [#allocation6]   ;;  %s741_s11 = smov [#allocation9]  }
   0x5   :  { %s36_s10 = sshll.u32 %s740_s30, 4  ;;  %s60_s12 = sshll.u32 %s741_s11, 4  ;;  %s37_s10 = int_to_ptr.vmem [resolvable:$true] %s36_s10  ;;  %s803_s12 = int_to_ptr.vmem [resolvable:$true] %s60_s12 }
   0x6   :  { %s576_s15 = scalar_lea.hbm %s958_s1, 256 }
   0x7   :  { %p577_p0 = scmp.ne.s32.totalorder %s958_s1, %s576_s15  ;;  %p580_p1 = scmp.lt.u32.totalorder %s576_s15, %s958_s1 }
   0x9   :  { %p582_p2 = pnand %p580_p1, %p577_p0 }
   0xb   :  { %585 = shalt.err (!%p582_p2)
}
   0xc   :  { %s586_s20 = scalar_lea.vmem %s37_s10, 256  ;;  %p591_p4 = scmp.lt.s32.totalorder %s37_s10, %s37_s10 }
   0xd   :  { %p587_p3 = scmp.ne.s32.totalorder %s37_s10, %s586_s20  ;;  %p592_p5 = scmp.lt.s32.totalorder %s586_s20, %s586_s20 }
   0xf   :  { %p593_p6 = por %p592_p5, %p591_p4 }
  0x11   :  { %p594_p7 = pnand %p593_p6, %p587_p3 }
  0x13   :  { %597 = shalt.err (!%p594_p7)
}
  0x14   :  { %s742_s21 = smov 128   ;;  %s743_s22 = smov 8  }
  0x15   :  { %42 = dma.hbm_to_vmem [thread:$0]  %s958_s1, 256, %s37_s10, [#allocation7], %s742_s21, %s742_s21, %s743_s22  }
  0x16   :  { %s598_s27 = scalar_lea.hbm %s960_s3, 512 }
  0x17   :  { %p599_p8 = scmp.ne.s32.totalorder %s960_s3, %s598_s27  ;;  %p602_p9 = scmp.lt.u32.totalorder %s598_s27, %s960_s3 }
  0x19   :  { %p604_p10 = pnand %p602_p9, %p599_p8 }
  0x1b   :  { %607 = shalt.err (!%p604_p10)
}
  0x1c   :  { %s608_s13 = scalar_lea.vmem %s803_s12, 512  ;;  %p613_p12 = scmp.lt.s32.totalorder %s803_s12, %s803_s12 }
  0x1d   :  { %p609_p11 = scmp.ne.s32.totalorder %s803_s12, %s608_s13  ;;  %p614_p13 = scmp.lt.s32.totalorder %s608_s13, %s608_s13 }
  0x1f   :  { %p615_p0 = por %p614_p13, %p613_p12 }
  0x21   :  { %p616_p1 = pnand %p615_p0, %p609_p11 }
  0x23   :  { %619 = shalt.err (!%p616_p1)
}
  0x24   :  { %66 = dma.hbm_to_vmem [thread:$0]  %s960_s3, 512, %s803_s12, [#allocation10], %s742_s21, %s742_s21, %s743_s22  }
  0x25   :  { %s744_s14 = smov [#allocation3]   ;;  %s745_s16 = smov [#allocation8]  }
  0x26   :  { %s24_s15 = sshll.u32 %s744_s14, 4  ;;  %s48_s17 = sshll.u32 %s745_s16, 4  ;;  %s25_s15 = int_to_ptr.vmem [resolvable:$true] %s24_s15  ;;  %s840_s17 = int_to_ptr.vmem [resolvable:$true] %s48_s17 }
  0x27   :  { %s620_s20 = scalar_lea.hbm %s957_s0, 256 }
  0x28   :  { %p621_p2 = scmp.ne.s32.totalorder %s957_s0, %s620_s20  ;;  %p624_p3 = scmp.lt.u32.totalorder %s620_s20, %s957_s0 }
  0x2a   :  { %p626_p4 = pnand %p624_p3, %p621_p2 }
  0x2c   :  { %629 = shalt.err (!%p626_p4)
}
  0x2d   :  { %s630_s3 = scalar_lea.vmem %s25_s15, 256  ;;  %p635_p6 = scmp.lt.s32.totalorder %s25_s15, %s25_s15 }
  0x2e   :  { %p631_p5 = scmp.ne.s32.totalorder %s25_s15, %s630_s3  ;;  %p636_p7 = scmp.lt.s32.totalorder %s630_s3, %s630_s3 }
  0x30   :  { %p637_p8 = por %p636_p7, %p635_p6 }
  0x32   :  { %p638_p9 = pnand %p637_p8, %p631_p5 }
  0x34   :  { %641 = shalt.err (!%p638_p9)
}
  0x35   :  { %30 = dma.hbm_to_vmem [thread:$0]  %s957_s0, 256, %s25_s15, [#allocation4], %s742_s21, %s742_s21, %s743_s22  }
  0x36   :  { %s642_s30 = scalar_lea.hbm %s959_s2, 256 }
  0x37   :  { %p643_p10 = scmp.ne.s32.totalorder %s959_s2, %s642_s30  ;;  %p646_p11 = scmp.lt.u32.totalorder %s642_s30, %s959_s2 }
  0x39   :  { %p648_p12 = pnand %p646_p11, %p643_p10 }
  0x3b   :  { %651 = shalt.err (!%p648_p12)
}
  0x3c   :  { %s652_s14 = scalar_lea.vmem %s840_s17, 256  ;;  %p657_p0 = scmp.lt.s32.totalorder %s840_s17, %s840_s17 }
  0x3d   :  { %p653_p13 = scmp.ne.s32.totalorder %s840_s17, %s652_s14  ;;  %p658_p1 = scmp.lt.s32.totalorder %s652_s14, %s652_s14 }
  0x3f   :  { %p659_p2 = por %p658_p1, %p657_p0 }
  0x41   :  { %p660_p3 = pnand %p659_p2, %p653_p13 }
  0x43   :  { %663 = shalt.err (!%p660_p3)
}
  0x44   :  { %54 = dma.hbm_to_vmem [thread:$0]  %s959_s2, 256, %s840_s17, [#allocation7], %s742_s21, %s742_s21, %s743_s22  }
  0x45   :  { %s746_s16 = smov [#allocation11]   ;;  %s747_s19 = smov [#allocation12]  }
  0x46   :  { %s72_s18 = sshll.u32 %s746_s16, 4  ;;  %s84_s20 = sshll.u32 %s747_s19, 4  ;;  %s73_s18 = int_to_ptr.vmem [resolvable:$true] %s72_s18  ;;  %s877_s20 = int_to_ptr.vmem [resolvable:$true] %s84_s20 }
  0x47   :  { %s664_s25 = scalar_lea.hbm %s961_s4, 512 }
  0x48   :  { %p665_p4 = scmp.ne.s32.totalorder %s961_s4, %s664_s25  ;;  %p668_p5 = scmp.lt.u32.totalorder %s664_s25, %s961_s4 }
  0x4a   :  { %p670_p6 = pnand %p668_p5, %p665_p4 }
  0x4c   :  { %673 = shalt.err (!%p670_p6)
}
  0x4d   :  { %s674_s2 = scalar_lea.vmem %s73_s18, 512  ;;  %p679_p8 = scmp.lt.s32.totalorder %s73_s18, %s73_s18 }
  0x4e   :  { %p675_p7 = scmp.ne.s32.totalorder %s73_s18, %s674_s2  ;;  %p680_p9 = scmp.lt.s32.totalorder %s674_s2, %s674_s2 }
  0x50   :  { %p681_p10 = por %p680_p9, %p679_p8 }
  0x52   :  { %p682_p11 = pnand %p681_p10, %p675_p7 }
  0x54   :  { %685 = shalt.err (!%p682_p11)
}
  0x55   :  { %78 = dma.hbm_to_vmem [thread:$0]  %s961_s4, 512, %s73_s18, [#allocation10], %s742_s21, %s742_s21, %s743_s22  }
  0x56   :  { %s686_s11 = scalar_lea.hbm %s962_s5, 512 }
  0x57   :  { %p687_p12 = scmp.ne.s32.totalorder %s962_s5, %s686_s11  ;;  %p690_p13 = scmp.lt.u32.totalorder %s686_s11, %s962_s5 }
  0x59   :  { %p692_p0 = pnand %p690_p13, %p687_p12 }
  0x5b   :  { %695 = shalt.err (!%p692_p0)
}
  0x5c   :  { %s696_s0 = scalar_lea.vmem %s877_s20, 512  ;;  %p701_p2 = scmp.lt.s32.totalorder %s877_s20, %s877_s20 }
  0x5d   :  { %p697_p1 = scmp.ne.s32.totalorder %s877_s20, %s696_s0  ;;  %p702_p3 = scmp.lt.s32.totalorder %s696_s0, %s696_s0 }
  0x5f   :  { %p703_p4 = por %p702_p3, %p701_p2 }
  0x61   :  { %p704_p5 = pnand %p703_p4, %p697_p1 }
  0x63   :  { %707 = shalt.err (!%p704_p5)
}
  0x64   :  { %90 = dma.hbm_to_vmem [thread:$0]  %s962_s5, 512, %s877_s20, [#allocation13], %s742_s21, %s742_s21, %s743_s22  }
  0x65   :  { %730 = dma.done.wait [#allocation4], 256  }
  0x66   :  { %731 = vsyncadd [#allocation4], 4294967040 }
  0x67   :  { %732 = dma.done.wait [#allocation7], 512  }
  0x68   :  { %733 = vsyncadd [#allocation7], 4294966784 }
  0x69   :  { %734 = dma.done.wait [#allocation10], 1024  }
  0x6a   :  { %735 = vsyncadd [#allocation10], 4294966272 }
  0x6b   :  { %736 = dma.done.wait [#allocation13], 512  }
  0x6c   :  { %737 = vsyncadd [#allocation13], 4294966784  ;;  %vm119_vm0 = vcmask 523264   ;;  %v748_v0 = vmov 0.0   ;;  %vm134_vm1 = vcmask 261120   ;;  %v226_v1 = vld [vmem:[#allocation11] sm:$0xff] }
  0x6d   :  { %123 = vst.msk [vmem:[#allocation2 + $0x18] sm:$0xff] %vm119_vm0, %v748_v0  ;;  %120 = vst.msk [vmem:[#allocation2] sm:$0xff] %vm119_vm0, %v748_v0  ;;  %v227_v2 = vld [vmem:[#allocation11 + $0x8] sm:$0xff]  ;;  %v228_v3 = vld [vmem:[#allocation11 + $0x10] sm:$0xff]  ;;  %s749_s22 = smov 64   ;;  %s750_s20 = smov [#allocation14]  }
  0x6e   :  { %121 = vst.msk [vmem:[#allocation2 + $0x8] sm:$0xff] %vm119_vm0, %v748_v0  ;;  %122 = vst.msk [vmem:[#allocation2 + $0x10] sm:$0xff] %vm119_vm0, %v748_v0  ;;  %v547_v4 = vpack.c.bf16 %v227_v2, %v226_v1  ;;  %v229_v5 = vld [vmem:[#allocation11 + $0x18] sm:$0xff]  ;;  %v224_v6 = vld [vmem:[#allocation6] sm:$0xff]  ;;  %s464_s23 = sshll.u32 %s750_s20, 4  ;;  %s465_s23 = int_to_ptr.vmem [resolvable:$true] %s464_s23 }
  0x6f   :  { %124 = vst.msk [vmem:[#allocation2 + $0x20] sm:$0xff] %vm119_vm0, %v748_v0  ;;  %125 = vst.msk [vmem:[#allocation2 + $0x28] sm:$0xff] %vm119_vm0, %v748_v0  ;;  %v551_v7 = vpack.c.bf16 %v229_v5, %v228_v3  ;;  %525 = vmatprep.mubr.msk.f32.mxu1 %vm134_vm1, %v224_v6  ;;  %v130_v8 = vld [vmem:[#allocation9] sm:$0xff]  ;;  %v131_v9 = vld [vmem:[#allocation9 + $0x8] sm:$0xff]  ;;  %p713_p7 = scmp.lt.s32.totalorder %s465_s23, %s465_s23 }
  0x70   :  { %v132_v10 = vld [vmem:[#allocation9 + $0x10] sm:$0xff]  ;;  %548 = vmatprep.subr.bf16.mxu1 %v547_v4  ;;  %v539_v11 = vpack.c.bf16 %v131_v9, %v130_v8  ;;  %v133_v12 = vld [vmem:[#allocation9 + $0x18] sm:$0xff]  ;;  %v320_v15 = vld [vmem:[#allocation12] sm:$0xff] }
  0x71   :  { %v128_v13 = vld [vmem:[#allocation3] sm:$0xff]  ;;  %550 = vmatpush3.bf16.msra.mxu1 %v547_v4  ;;  %v543_v14 = vpack.c.bf16 %v133_v12, %v132_v10  ;;  %v321_v16 = vld [vmem:[#allocation12 + $0x8] sm:$0xff]  ;;  %v323_v20 = vld [vmem:[#allocation12 + $0x18] sm:$0xff] }
  0x72   :  { %514 = vmatprep.mubr.msk.f32.mxu0 %vm134_vm1, %v128_v13  ;;  %552 = vmatprep.subr.bf16.mxu1 %v551_v7  ;;  %v555_v17 = vpack.c.bf16 %v321_v16, %v320_v15  ;;  %v225_v18 = vld [vmem:[#allocation6 + $0x8] sm:$0xff]  ;;  %v322_v19 = vld [vmem:[#allocation12 + $0x10] sm:$0xff]  ;;  %v129_v21 = vld [vmem:[#allocation3 + $0x8] sm:$0xff] }
  0x73   :  { %540 = vmatprep.subr.bf16.mxu0 %v539_v11  ;;  %v559_v22 = vpack.c.bf16 %v323_v20, %v322_v19  ;;  %v318_v23 = vld [vmem:[#allocation8] sm:$0xff]  ;;  %v319_v24 = vld [vmem:[#allocation8 + $0x8] sm:$0xff]  ;;  %v486_v38 = vld [vmem:[%s964_s7] ss:$0 sm:$0xff] }
  0x74   :  { %542 = vmatpush3.bf16.msra.mxu0 %v539_v11  ;;  %v223_v25 = vld [vmem:[#allocation2 + $0x18] sm:$0xff]  ;;  %v126_v31 = vld [vmem:[#allocation2] sm:$0xff] }
  0x75   :  { %544 = vmatprep.subr.bf16.mxu0 %v543_v14  ;;  %554 = vmatpush3.bf16.msra.mxu1 %v551_v7  ;;  %v222_v26 = vld [vmem:[#allocation2 + $0x10] sm:$0xff]  ;;  %v127_v28 = vld [vmem:[#allocation2 + $0x8] sm:$0xff]  ;;  %v487_v48 = vld [vmem:[%s965_s8] ss:$0 sm:$0xff]  ;;  %s708_s8 = scalar_lea.vmem %s465_s23, 512 }
  0x76   :  { %v317_v37 = vld [vmem:[#allocation2 + $0x28] sm:$0xff]  ;;  %v316_v39 = vld [vmem:[#allocation2 + $0x20] sm:$0xff]  ;;  %p709_p6 = scmp.ne.s32.totalorder %s465_s23, %s708_s8  ;;  %p714_p8 = scmp.lt.s32.totalorder %s708_s8, %s708_s8 }
  0x77   :  { %v485_v53 = vld [vmem:[%s963_s6] ss:$0 sm:$0xff] }
  0x78   :  { %546 = vmatpush3.bf16.msra.mxu0 %v543_v14  ;;  %526 = vmatmul.mubr.msk.f32.vlgmr.msra.gmra.mrb[0].mxu1 %vm134_vm1, %v225_v18  ;;  %p715_p9 = por %p714_p8, %p713_p7 }
  0x79   :  { %556 = vmatprep.subr.bf16.mxu0 %v555_v17 }
  0x7a   :  { %p716_p10 = pnand %p715_p9, %p709_p6 }
  0x7b   :  { %515 = vmatmul.mubr.msk.f32.vlgmr.msra.gmra.mrb[0].mxu0 %vm134_vm1, %v129_v21 }
  0x7c   :  { %558 = vmatpush3.bf16.msra.mxu0 %v555_v17  ;;  %536 = vmatprep.mubr.msk.f32.mxu0 %vm134_vm1, %v318_v23 }
  0x7d   :  { %560 = vmatprep.subr.bf16.mxu0 %v559_v22 }
  0x80   :  { %562 = vmatpush3.bf16.msra.mxu0 %v559_v22 }
  0x83   :  { %537 = vmatmul.mubr.msk.f32.vlgmr.msra.gmra.mrb[2].mxu0 %vm134_vm1, %v319_v24 }
 0x14b   :  { %v527_v27 = vpop.f32.mrb[0].mxu1 }
 0x14c   :  { %v312_v29 = vadd.f32 %v527_v27, %v223_v25  ;;  %v302_v30 = vpop.f32.mrb[1].mxu1 }
 0x14d   :  { %v311_v32 = vadd.f32 %v302_v30, %v222_v26 }
 0x14e   :  { %v516_v33 = vpop.f32.mrb[0].mxu0  ;;  %314 = vst.msk [vmem:[#allocation2 + $0x18] sm:$0xff] %vm119_vm0, %v312_v29 }
 0x14f   :  { %v217_v34 = vadd.f32 %v516_v33, %v127_v28  ;;  %v207_v35 = vpop.f32.mrb[1].mxu0  ;;  %313 = vst.msk [vmem:[#allocation2 + $0x10] sm:$0xff] %vm119_vm0, %v311_v32 }
 0x150   :  { %v216_v36 = vadd.f32 %v207_v35, %v126_v31 }
 0x151   :  { %220 = vst.msk [vmem:[#allocation2 + $0x8] sm:$0xff] %vm119_vm0, %v217_v34 }
 0x152   :  { %219 = vst.msk [vmem:[#allocation2] sm:$0xff] %vm119_vm0, %v216_v36 }
 0x155   :  { %v424_v46 = vld [vmem:[#allocation2 + $0x18] sm:$0xff] }
 0x156   :  { %v538_v40 = vpop.f32.mrb[2].mxu0  ;;  %v423_v41 = vld [vmem:[#allocation2 + $0x10] sm:$0xff]  ;;  %v433_v47 = vadd.f32 %v486_v38, %v424_v46 }
 0x157   :  { %v406_v42 = vadd.f32 %v538_v40, %v317_v37  ;;  %v396_v43 = vpop.f32.mrb[3].mxu0  ;;  %v432_v44 = vadd.f32 %v486_v38, %v423_v41 }
 0x158   :  { %v405_v45 = vadd.f32 %v396_v43, %v316_v39  ;;  %v413_v57 = vld [vmem:[#allocation2 + $0x8] sm:$0xff] }
 0x159   :  { %408 = vst.msk [vmem:[#allocation2 + $0x28] sm:$0xff] %vm119_vm0, %v406_v42  ;;  %447 = vrot.lane.b32.xlu0 %v432_v44, %s749_s22  ;;  %v412_v54 = vld [vmem:[#allocation2] sm:$0xff]  ;;  %v422_v59 = vadd.f32 %v485_v53, %v413_v57 }
 0x15a   :  { %407 = vst.msk [vmem:[#allocation2 + $0x20] sm:$0xff] %vm119_vm0, %v405_v45  ;;  %v421_v55 = vadd.f32 %v485_v53, %v412_v54 }
 0x15d   :  { %449 = vrot.lane.b32.xlu0 %v433_v47, %s749_s22 }
 0x160   :  { %v435_v49 = vld [vmem:[#allocation2 + $0x28] sm:$0xff] }
 0x161   :  { %v434_v50 = vld [vmem:[#allocation2 + $0x20] sm:$0xff]  ;;  %v444_v51 = vadd.f32 %v487_v48, %v435_v49 }
 0x162   :  { %v443_v52 = vadd.f32 %v487_v48, %v434_v50 }
 0x163   :  { %458 = vst.msk [vmem:[#allocation14 + $0x18] sm:$0xff] %vm119_vm0, %v444_v51 }
 0x164   :  { %456 = vst.msk [vmem:[#allocation14 + $0x8] sm:$0xff] %vm119_vm0, %v443_v52 }
 0x1cb   :  { %v448_v56 = vpop.permute.xlu0 %447 }
 0x1cc   :  { %v453_v58 = vsel %vm119_vm0, %v421_v55, %v448_v56 }
 0x1cd   :  { %455 = vst [vmem:[#allocation14] sm:$0xff] %v453_v58 }
 0x1cf   :  { %v450_v60 = vpop.permute.xlu0 %449 }
 0x1d0   :  { %v454_v61 = vsel %vm119_vm0, %v422_v59, %v450_v60 }
 0x1d1   :  { %457 = vst [vmem:[#allocation14 + $0x10] sm:$0xff] %v454_v61 }
 0x1d2   :  { %719 = shalt.err (!%p716_p10)
}
 0x1d3   :  { %s720_s25 = scalar_lea.hbm %s966_s9, 512 }
 0x1d4   :  { %p721_p11 = scmp.ne.s32.totalorder %s966_s9, %s720_s25  ;;  %p724_p12 = scmp.lt.u32.totalorder %s720_s25, %s966_s9 }
 0x1d6   :  { %p726_p13 = pnand %p724_p12, %p721_p11 }
 0x1d8   :  { %729 = shalt.err (!%p726_p13)
}
 0x1d9   :  { %s751_s2 = smov 256   ;;  %s752_s17 = smov 16  }
 0x1da   :  { %470 = dma.vmem_to_hbm [thread:$0]  %s465_s23, 512, %s966_s9, [#allocation5], %s751_s2, %s751_s2, %s752_s17  }
 0x1db   :  { %738 = dma.done.wait [#allocation5], 512  }
 0x1dc   :  { %739 = vsyncadd [#allocation5], 4294966784 }
 0x1dd   :  { %474 = vsyncpa [#allocation4], 1 }
 0x1de   :  { %475 = vsyncpa [#allocation7], 1 }
 0x1df   :  { %476 = vsyncpa [#allocation10], 1 }
 0x1e0   :  { %477 = vsyncpa [#allocation13], 1 }
 0x1e1   :  { %478 = vsyncpa [#allocation5], 1 }

</bundles_post_ra>
